<compile_context>
chip_gen: v5e
topology: v5e:2x2
jax: 0.10.0
libtpu: 0.0.40
codegen_flags: <defaults>
</compile_context>

<pallas_src>
from functools import partial

import jax
import jax.numpy as jnp
from jax.experimental import pallas as pl
from jax.experimental.pallas import tpu as pltpu


# ---------------------------------------------------------------------------
# Parameter packing: one slab, one DMA.
#   rows  0:32  lanes 0:32       -> W2  [32, 32]
#   rows 32:64  lanes 0:out_dim  -> W3  [32, 2*LayerNo]
#   row  64     lanes 0:32       -> w1  [1, 32]   (fc1 weight, in_features == 1)
#   row  65     lanes 0:32       -> b1  [1, 32]
#   row  66     lanes 0:32       -> b2  [1, 32]
#   row  67     lanes 0:out_dim  -> b3  [1, 2*LayerNo]
# ---------------------------------------------------------------------------
def pack_params(w1, b1, w2, b2, w3, b3):
    out_dim = w3.shape[1]
    cols = max(32, out_dim)
    slab = jnp.zeros((68, cols), jnp.float32)
    slab = slab.at[0:32, 0:32].set(w2.astype(jnp.float32))
    slab = slab.at[32:64, 0:out_dim].set(w3.astype(jnp.float32))
    slab = slab.at[64, 0:32].set(w1[0].astype(jnp.float32))
    slab = slab.at[65, 0:32].set(b1[0].astype(jnp.float32))
    slab = slab.at[66, 0:32].set(b2[0].astype(jnp.float32))
    slab = slab.at[67, 0:out_dim].set(b3[0].astype(jnp.float32))
    return slab


def _softplus_like_torch(x):
    # PyTorch nn.Softplus(beta=1, threshold=20): returns x where x > 20.
    safe = jnp.where(x > 20.0, 0.0, x)
    return jnp.where(x > 20.0, x, jnp.log1p(jnp.exp(safe)))


def condition_network_kernel(x_ref, p_ref, out_a_ref, out_b_ref, *, layer_no):
    out_dim = 2 * layer_no

    # Scalar input x[0, 0] from SMEM.
    x0 = x_ref[0]

    # Static views into the packed parameter slab (single DMA'd VMEM buffer).
    w2 = p_ref[0:32, 0:32]                # [32, 32]
    w3 = p_ref[32:64, 0:out_dim]          # [32, 2*LayerNo]
    w1 = p_ref[64:65, 0:32]               # [1, 32]
    b1 = p_ref[65:66, 0:32]               # [1, 32]
    b2 = p_ref[66:67, 0:32]               # [1, 32]
    b3 = p_ref[67:68, 0:out_dim]          # [1, 2*LayerNo]

    # fc1: in_features == 1 -> scalar * weight row + bias.
    h1 = jnp.maximum(x0 * w1 + b1, 0.0)                                   # [1, 32]

    # fc2 + ReLU
    h2 = jnp.dot(h1, w2, preferred_element_type=jnp.float32) + b2         # [1, 32]
    h2 = jnp.maximum(h2, 0.0)

    # fc3 + Softplus
    h3 = jnp.dot(h2, w3, preferred_element_type=jnp.float32) + b3         # [1, 2*LayerNo]
    y = _softplus_like_torch(h3)

    out_a_ref[...] = y[:, :layer_no]
    out_b_ref[...] = y[:, layer_no:]


def init_params(key, layer_no, dtype=jnp.float32):
    """Deterministic parameter init (PyTorch-Linear-style uniform ranges)."""
    ks = jax.random.split(key, 6)

    def linear(kw, kb, fan_in, fan_out):
        bound = 1.0 / jnp.sqrt(jnp.asarray(fan_in, jnp.float32))
        # stored as [in, out] (transposed vs. torch's [out, in])
        w = jax.random.uniform(kw, (fan_in, fan_out), dtype, -bound, bound)
        b = jax.random.uniform(kb, (1, fan_out), dtype, -bound, bound)
        return w, b

    w1, b1 = linear(ks[0], ks[1], 1, 32)
    w2, b2 = linear(ks[2], ks[3], 32, 32)
    w3, b3 = linear(ks[4], ks[5], 32, 2 * layer_no)
    return (w1, b1, w2, b2, w3, b3)


@partial(jax.jit, static_argnums=(2,))
def condition_network_forward(x, slab, layer_no):
    out_dim = 2 * layer_no

    # Only x[0, 0] is ever consumed -> pass it as a single SMEM scalar.
    x0 = x[0, 0].astype(jnp.float32).reshape(1)

    cost = pl.CostEstimate(
        flops=2 * (32 + 32 * 32 + 32 * out_dim) + 5 * 32 + 2 * out_dim,
        transcendentals=2 * out_dim,                       # exp + log1p per output
        bytes_accessed=slab.size * 4 + 4 + out_dim * 4,
    )

    kernel = partial(condition_network_kernel, layer_no=layer_no)
    out_a, out_b = pl.pallas_call(
        kernel,
        out_shape=(
            jax.ShapeDtypeStruct((1, layer_no), jnp.float32),
            jax.ShapeDtypeStruct((1, layer_no), jnp.float32),
        ),
        in_specs=[
            pl.BlockSpec(memory_space=pltpu.MemorySpace.SMEM),   # x scalar
            pl.BlockSpec(memory_space=pltpu.MemorySpace.VMEM),   # packed params
        ],
        out_specs=(
            pl.BlockSpec(memory_space=pltpu.MemorySpace.VMEM),
            pl.BlockSpec(memory_space=pltpu.MemorySpace.VMEM),
        ),
        cost_estimate=cost,
    )(x0, slab)

    # Squeeze fuses inside this jit; no standalone post-kernel slice ops.
    return out_a[0], out_b[0]


def reference_forward(x, params, layer_no):
    """Pure-JAX reference for correctness check."""
    w1, b1, w2, b2, w3, b3 = params
    h = x[:, 0:1].astype(jnp.float32)
    h = jax.nn.relu(h @ w1 + b1)
    h = jax.nn.relu(h @ w2 + b2)
    h = h @ w3 + b3
    h = jnp.where(h > 20.0, h, jnp.log1p(jnp.exp(jnp.where(h > 20.0, 0.0, h))))
    return h[0, :layer_no], h[0, layer_no:]


if __name__ == "__main__":
    key = jax.random.PRNGKey(0)
    k_x, k_p = jax.random.split(key)

    LAYER_NO = 8          # -> fc3 output dim = 16
    B, F_IN = 2, 4        # small batch, a few input features (only x[0,0] is used)

    x = jax.random.normal(k_x, (B, F_IN), jnp.float32)
    params = init_params(k_p, LAYER_NO)
    slab = pack_params(*params)           # packed once, reused every step

    out_a, out_b = condition_network_forward(x, slab, LAYER_NO)
    out_a, out_b = jax.block_until_ready((out_a, out_b))

    ref_a, ref_b = reference_forward(x, params, LAYER_NO)
    assert out_a.shape == (LAYER_NO,) and out_b.shape == (LAYER_NO,)
    assert jnp.allclose(out_a, ref_a, atol=1e-5, rtol=1e-5)
    assert jnp.allclose(out_b, ref_b, atol=1e-5, rtol=1e-5)

    print("KERNEL_OK")
</pallas_src>

<mosaic_0001>
module attributes {stable_mosaic.version = 11 : i64} {
  func.func @condition_network_kernel(%arg0: memref<1xf32, #tpu.memory_space<smem>>, %arg1: memref<68x32xf32, #tpu.memory_space<vmem>>, %arg2: memref<1x8xf32, #tpu.memory_space<vmem>>, %arg3: memref<1x8xf32, #tpu.memory_space<vmem>>) attributes {dimension_semantics = [], scalar_prefetch = 0 : i64, scratch_operands = 0 : i64, tpu.core_type = #tpu.core_type<tc>} {
    %c0 = arith.constant 0 : index
    %0 = memref.load %arg0[%c0] : memref<1xf32, #tpu.memory_space<smem>>
    %c0_0 = arith.constant 0 : index
    %c0_1 = arith.constant 0 : index
    %1 = vector.load %arg1[%c0_0, %c0_1] : memref<68x32xf32, #tpu.memory_space<vmem>>, vector<32x32xf32>
    %c32 = arith.constant 32 : index
    %c0_2 = arith.constant 0 : index
    %2 = vector.load %arg1[%c32, %c0_2] : memref<68x32xf32, #tpu.memory_space<vmem>>, vector<32x16xf32>
    %c64 = arith.constant 64 : index
    %c0_3 = arith.constant 0 : index
    %3 = vector.load %arg1[%c64, %c0_3] : memref<68x32xf32, #tpu.memory_space<vmem>>, vector<1x32xf32>
    %c65 = arith.constant 65 : index
    %c0_4 = arith.constant 0 : index
    %4 = vector.load %arg1[%c65, %c0_4] : memref<68x32xf32, #tpu.memory_space<vmem>>, vector<1x32xf32>
    %c66 = arith.constant 66 : index
    %c0_5 = arith.constant 0 : index
    %5 = vector.load %arg1[%c66, %c0_5] : memref<68x32xf32, #tpu.memory_space<vmem>>, vector<1x32xf32>
    %c67 = arith.constant 67 : index
    %c0_6 = arith.constant 0 : index
    %6 = vector.load %arg1[%c67, %c0_6] : memref<68x32xf32, #tpu.memory_space<vmem>>, vector<1x16xf32>
    %7 = vector.broadcast %0 : f32 to vector<1x32xf32>
    %8 = arith.mulf %7, %3 : vector<1x32xf32>
    %9 = arith.addf %8, %4 : vector<1x32xf32>
    %cst = arith.constant 0.000000e+00 : f32
    %10 = vector.broadcast %cst : f32 to vector<1x32xf32>
    %11 = arith.maximumf %9, %10 : vector<1x32xf32>
    %cst_7 = arith.constant dense<0.000000e+00> : vector<1x32xf32>
    %12 = tpu.matmul %11, %1, %cst_7 {dimension_numbers = #tpu.dot_dimension_numbers<[1], [0], [0], [1], [0, 0, 1, 1], [], []>} : vector<1x32xf32>, vector<32x32xf32>, vector<1x32xf32> -> vector<1x32xf32>
    %13 = arith.addf %12, %5 : vector<1x32xf32>
    %cst_8 = arith.constant 0.000000e+00 : f32
    %14 = vector.broadcast %cst_8 : f32 to vector<1x32xf32>
    %15 = arith.maximumf %13, %14 : vector<1x32xf32>
    %cst_9 = arith.constant dense<0.000000e+00> : vector<1x16xf32>
    %16 = tpu.matmul %15, %2, %cst_9 {dimension_numbers = #tpu.dot_dimension_numbers<[1], [0], [0], [1], [0, 0, 1, 1], [], []>} : vector<1x32xf32>, vector<32x16xf32>, vector<1x16xf32> -> vector<1x16xf32>
    %17 = arith.addf %16, %6 : vector<1x16xf32>
    %cst_10 = arith.constant 2.000000e+01 : f32
    %18 = vector.broadcast %cst_10 : f32 to vector<1x16xf32>
    %19 = arith.cmpf ogt, %17, %18 : vector<1x16xf32>
    %cst_11 = arith.constant 0.000000e+00 : f32
    %20 = vector.broadcast %cst_11 : f32 to vector<1x16xf32>
    %21 = arith.select %19, %20, %17 : vector<1x16xi1>, vector<1x16xf32>
    %cst_12 = arith.constant 2.000000e+01 : f32
    %22 = vector.broadcast %cst_12 : f32 to vector<1x16xf32>
    %23 = arith.cmpf ogt, %17, %22 : vector<1x16xf32>
    %24 = math.exp %21 : vector<1x16xf32>
    %25 = math.log1p %24 : vector<1x16xf32>
    %26 = arith.select %23, %17, %25 : vector<1x16xi1>, vector<1x16xf32>
    %27 = vector.extract_strided_slice %26 {offsets = [0, 0], sizes = [1, 8], strides = [1, 1]} : vector<1x16xf32> to vector<1x8xf32>
    %c0_13 = arith.constant 0 : index
    %c0_14 = arith.constant 0 : index
    %28 = vector.load %arg2[%c0_13, %c0_14] : memref<1x8xf32, #tpu.memory_space<vmem>>, vector<1x8xf32>
    tpu.vector_store %arg2[%c0_13, %c0_14], %27 {strides = array<i32>} : memref<1x8xf32, #tpu.memory_space<vmem>>, vector<1x8xf32>,
    %29 = vector.extract_strided_slice %26 {offsets = [0, 8], sizes = [1, 8], strides = [1, 1]} : vector<1x16xf32> to vector<1x8xf32>
    %c0_15 = arith.constant 0 : index
    %c0_16 = arith.constant 0 : index
    %30 = vector.load %arg3[%c0_15, %c0_16] : memref<1x8xf32, #tpu.memory_space<vmem>>, vector<1x8xf32>
    tpu.vector_store %arg3[%c0_15, %c0_16], %29 {strides = array<i32>} : memref<1x8xf32, #tpu.memory_space<vmem>>, vector<1x8xf32>,
    return
  }
}

</mosaic_0001>

<bundles_post_ra>
// kernel: condition_network_forward.1
= control target key start
LH: loop header
LB: loop body
LE: loop exit
PB: predicated region body
PF: predicated region fallthrough
CT: control target
= control target key end

     0   :  { %10 = vsyncpa [#allocation4], 0  ;;  %s265_s0 = inlined_call_operand.<no memory space> [shape: f32[1], index: 0, kind: input, shape index: {}]   ;;  %s266_s1 = inlined_call_operand.vmem [shape: f32[68,32], index: 1, kind: input, shape index: {}]   ;;  %s267_s2 = inlined_call_operand.hbm [shape: f32[1,8], index: 2, kind: output, shape index: {0}]   ;;  %s268_s3 = inlined_call_operand.hbm [shape: f32[1,8], index: 3, kind: output, shape index: {1}]  }
   0x1   :  { %v20_v0 = vld [vmem:[%s266_s1 + $0x18] sm:$0xff]  ;;  %v19_v1 = vld [vmem:[%s266_s1 + $0x10] sm:$0xff]  ;;  %v29_v2 = vstv %s265_s0  ;;  %v25_v3 = vld [vmem:[%s266_s1 + $0x40] sm:$0x1] }
   0x2   :  { %49 = vmatpush.msra.mxu0 %v20_v0  ;;  %v26_v4 = vld [vmem:[%s266_s1 + $0x41] sm:$0x1]  ;;  %v18_v5 = vld [vmem:[%s266_s1 + $0x8] sm:$0xff]  ;;  %v30_v6 = vmul.f32 %v29_v2, %v25_v3  ;;  %v24_v7 = vld [vmem:[%s266_s1 + $0x38] sm:$0xff] }
   0x3   :  { %11 = vsyncpa [#allocation6], 0  ;;  %73 = vmatpush.msra.mxu1 %v24_v7  ;;  %v17_v8 = vld [vmem:[%s266_s1] sm:$0xff]  ;;  %vm33_vm0 = vcmask 261120   ;;  %v23_v11 = vld [vmem:[%s266_s1 + $0x30] sm:$0xff]  ;;  %s195_s10 = smov [#allocation3]  }
   0x4   :  { %50 = vmatpush.msra.mxu0 %v19_v1  ;;  %v31_v9 = vadd.f32 %v30_v6, %v26_v4  ;;  %v22_v12 = vld [vmem:[%s266_s1 + $0x28] sm:$0xff]  ;;  %v21_v13 = vld [vmem:[%s266_s1 + $0x20] sm:$0xff]  ;;  %s107_s11 = sshll.u32 %s195_s10, 4  ;;  %vm95_vm3 = vcmask 57344   ;;  %s196_s14 = smov 120   ;;  %s108_s11 = int_to_ptr.vmem [resolvable:$true] %s107_s11 }
   0x5   :  { %74 = vmatpush.msra.mxu1 %v23_v11  ;;  %v27_v14 = vld [vmem:[%s266_s1 + $0x42] sm:$0x1]  ;;  %v28_v18 = vld [vmem:[%s266_s1 + $0x43] sm:$0x1]  ;;  %s109_s1 = sshll.u32 %s267_s2, 4  ;;  %s197_s15 = smov [#allocation5]   ;;  %s110_s1 = int_to_ptr.hbm [resolvable:$true] %s109_s1 }
   0x6   :  { %51 = vmatpush.msra.mxu0 %v18_v5  ;;  %v32_v10 = vmax.f32 %v31_v9, 0.0  ;;  %s118_s16 = sshll.u32 %s197_s15, 4  ;;  %s120_s19 = sshll.u32 %s268_s3, 4  ;;  %s119_s16 = int_to_ptr.vmem [resolvable:$true] %s118_s16  ;;  %s121_s19 = int_to_ptr.hbm [resolvable:$true] %s120_s19 }
   0x7   :  { %75 = vmatpush.msra.mxu1 %v22_v12 }
   0x8   :  { %52 = vmatpush.msra.mxu0 %v17_v8 }
   0x9   :  { %134 = vmatmul.msk.f32.vlgmr.msra.gmra.mxu0 %vm33_vm0, %v32_v10  ;;  %76 = vmatpush.msra.mxu1 %v21_v13 }
  0x86   :  { %v54_v15 = vpop.f32.mrf.mxu0 }
  0x87   :  { %v55_v16 = vadd.f32 %v54_v15, %v27_v14 }
  0x89   :  { %v57_v17 = vmax.f32 %v55_v16, 0.0 }
  0x8b   :  { %135 = vmatmul.msk.f32.vlgmr.msra.gmra.mxu1 %vm33_vm0, %v57_v17 }
 0x108   :  { %v78_v19 = vpop.f32.mrf.mxu1 }
 0x109   :  { %v79_v20 = vadd.f32 %v78_v19, %v28_v18 }
 0x10b   :  { %vm81_vm1 = vcmp.gt.f32.partialorder %v79_v20, 20.0 }
 0x10c   :  { %v82_v21 = vsel %vm81_vm1, 0.0, %v79_v20 }
 0x10d   :  { %v83_v22 = vmul.f32 1.442695, %v82_v21 }
 0x10f   :  { %139 = vpow2.f32 %v83_v22 }
 0x115   :  { %v140_v23 = vpop.eup %139 }
 0x116   :  { %v85_v24 = vadd.f32 1.0, %v140_v23  ;;  %v88_v25 = vmul.f32 -0.5, %v140_v23  ;;  %v91_v27 = vand.u32 2147483647, %v140_v23 }
 0x118   :  { %141 = vlog2.f32 %v85_v24  ;;  %v89_v26 = vadd.f32 1.0, %v88_v25  ;;  %vm92_vm2 = vcmp.lt.f32.partialorder %v91_v27, 0.0004427343 }
 0x11a   :  { %v90_v30 = vmul.f32 %v140_v23, %v89_v26 }
 0x11e   :  { %v142_v28 = vpop.eup %141 }
 0x11f   :  { %v87_v29 = vmul.f32 0.6931472, %v142_v28 }
 0x121   :  { %v93_v31 = vsel %vm92_vm2, %v90_v30, %v87_v29 }
 0x122   :  { %v94_v32 = vsel %vm81_vm1, %v79_v20, %v93_v31 }
 0x123   :  { %96 = vst.msk [vmem:[#allocation3] sm:$0x1] %vm95_vm3, %v94_v32  ;;  %98 = vrot.lane.b32.xlu0 %v94_v32, %s196_s14 }
 0x124   :  { %112 = dma.vmem_to_hbm [thread:$0]  %s108_s11, 16, %s110_s1, [#allocation4]  }
 0x195   :  { %v99_v33 = vpop.permute.xlu0 %98 }
 0x196   :  { %101 = vst.msk [vmem:[#allocation5] sm:$0x1] %vm95_vm3, %v99_v33 }
 0x197   :  { %123 = dma.vmem_to_hbm [thread:$0]  %s119_s16, 16, %s121_s19, [#allocation6]  }
 0x198   :  { %191 = dma.done.wait [#allocation4], 16  }
 0x199   :  { %192 = vsyncadd [#allocation4], 4294967280 }
 0x19a   :  { %193 = dma.done.wait [#allocation6], 16  }
 0x19b   :  { %194 = vsyncadd [#allocation6], 4294967280 }
 0x19c   :  { %132 = vsyncpa [#allocation4], 1 }
 0x19d   :  { %133 = vsyncpa [#allocation6], 1 }

</bundles_post_ra>
